<compile_context>
chip_gen: v7x
topology: tpu7x:2x2x1
jax: 0.10.0
libtpu: 0.0.40
codegen_flags: <defaults>
</compile_context>

<pallas_src>
from functools import lru_cache, partial

import numpy as np
import jax
import jax.numpy as jnp
from jax.experimental import pallas as pl
from jax.experimental.pallas import tpu as pltpu


# ------------------ deterministic parameter construction (host-side glue) ------------------

def gaussian_kernel_1d(sigma: int) -> np.ndarray:
    """kornia get_gaussian_kernel1d for the odd window size 6*sigma + 1."""
    ksize = int(sigma) * 6 + 1
    x = np.arange(ksize, dtype=np.float64) - (ksize - 1) / 2.0
    g = np.exp(-(x ** 2) / (2.0 * float(sigma) ** 2))
    return (g / g.sum()).astype(np.float32)


def _reflect(i: int, n: int) -> int:
    # PyTorch / kornia 'reflect' border (no edge repeat).
    if i < 0:
        return -i
    if i >= n:
        return 2 * (n - 1) - i
    return i


def blur_matrix(n: int, k1d: np.ndarray) -> np.ndarray:
    """(n, n) matrix A such that A @ x == 1-D gaussian conv of x with reflect pad."""
    r = (len(k1d) - 1) // 2
    assert r < n, "kernel radius must be smaller than spatial dim for reflect pad"
    A = np.zeros((n, n), dtype=np.float32)
    for i in range(n):
        for d in range(-r, r + 1):
            A[i, _reflect(i + d, n)] += float(k1d[d + r])
    return A


def diff_matrix(n: int) -> np.ndarray:
    """(n, n) matrix D s.t. D @ x == torch.diff(x, dim=0, append=x[-1:]) (last row = 0)."""
    D = np.zeros((n, n), dtype=np.float32)
    for i in range(n - 1):
        D[i, i] = -1.0
        D[i, i + 1] = 1.0
    return D


def _choose_tile_batch(nc: int, w: int, lane_cap: int = 256) -> int:
    """Largest divisor TB of nc with TB*W <= lane_cap (MXU-native width),
    preferring TB*W that is a multiple of 128 (full lane occupancy)."""
    divs = [tb for tb in range(1, nc + 1) if nc % tb == 0 and tb * w <= lane_cap]
    if not divs:
        return 1
    full_lane = [tb for tb in divs if (tb * w) % 128 == 0]
    return max(full_lane) if full_lane else max(divs)


@lru_cache(maxsize=None)
def _gmse_constants(H: int, Hp: int, W: int, TB: int, sigma: int):
    """Stencil matrices cached per (H, Hp, W, TB, sigma); bf16 for MXU operands."""
    k1d = gaussian_kernel_1d(sigma)
    DH = np.zeros((Hp, Hp), dtype=np.float32)
    AH = np.zeros((Hp, Hp), dtype=np.float32)
    DH[:H, :H] = diff_matrix(H)                       # diff along H (append last row)
    AH[:H, :H] = blur_matrix(H, k1d)                  # reflect-pad blur along H
    eye_tb = np.eye(TB, dtype=np.float32)
    DWT = np.kron(eye_tb, diff_matrix(W).T)           # block-diag diff along W
    AWT = np.kron(eye_tb, blur_matrix(W, k1d).T)      # block-diag blur along W
    as_bf16 = lambda a: jnp.asarray(a, dtype=jnp.bfloat16)
    return as_bf16(DH), as_bf16(DWT), as_bf16(AH), as_bf16(AWT)


# -------------------------------------- Pallas kernel --------------------------------------

def _make_gmse_kernel(gamma: float, H: int, Hp: int):
    """One pass: disparity -> reflect gaussian blur -> **gamma, plus weighted-MSE partials.

    reals_ref / fakes_ref: (Hp, TB*W) lane-dense f32 slab (TB images side by side,
    H zero-padded to Hp).  Emits per-step partials
    [min(offset), max(offset), sum(offset*d^2), sum(d^2)].
    """
    need_row_mask = (Hp != H)

    def kernel(reals_ref, fakes_ref, dh_ref, dwt_ref, ah_ref, awt_ref, partials_ref):
        r = reals_ref[...]                                # (Hp, TBW) f32
        f = fakes_ref[...]
        r_bf = r.astype(jnp.bfloat16)                     # bf16 MXU operands, f32 accumulation

        # torch.diff along H / W (last difference is 0), as MXU matmuls.
        xd = jnp.dot(dh_ref[...], r_bf, preferred_element_type=jnp.float32)
        yd = jnp.dot(r_bf, dwt_ref[...], preferred_element_type=jnp.float32)
        disp = jnp.sqrt(xd * xd + yd * yd)

        # Separable reflect-padded gaussian blur: A_H @ disp @ blockdiag(A_W^T).
        t = jnp.dot(ah_ref[...], disp.astype(jnp.bfloat16),
                    preferred_element_type=jnp.float32)
        blur = jnp.dot(t.astype(jnp.bfloat16), awt_ref[...],
                       preferred_element_type=jnp.float32)

        # offset = blur ** gamma; specialize common static gammas (cuts EUP pushes).
        if gamma == 0.0:
            offset = jnp.ones_like(blur)                  # torch: x**0 == 1 (incl. 0**0)
        elif gamma == 0.5:
            offset = jnp.sqrt(blur)
        elif gamma == 1.0:
            offset = blur
        elif gamma == 2.0:
            offset = blur * blur
        else:
            # blur >= 0; clamp avoids log(0).
            # TODO(synk): torch gives 0**gamma == inf for gamma < 0; here it is huge-but-finite.
            offset = jnp.exp(jnp.float32(gamma) * jnp.log(jnp.maximum(blur, 1e-30)))

        d = r - f                                         # weighted-MSE path stays f32
        d2 = d * d

        if need_row_mask:
            # Padded rows carry blur==0 -> offset ~ 0; keep them out of min/max.
            rows = jax.lax.broadcasted_iota(jnp.int32, offset.shape, 0)
            valid = rows < H
            off_min = jnp.min(jnp.where(valid, offset, jnp.inf))
            off_max = jnp.max(jnp.where(valid, offset, -jnp.inf))
            # Padded rows have r == f == 0 -> d2 == 0, so the sums need no masking.
        else:
            off_min = jnp.min(offset)
            off_max = jnp.max(offset)

        partials_ref[0, 0] = off_min
        partials_ref[0, 1] = off_max
        partials_ref[0, 2] = jnp.sum(offset * d2)
        partials_ref[0, 3] = jnp.sum(d2)

    return kernel


# ----------------------------------------- wrapper -----------------------------------------

@partial(jax.jit, static_argnums=(2, 3))
def gmse_loss(fakes, reals, gamma, sigma):
    """Pallas implementation of GMSE.forward(fakes, reals, gamma, sigma).

    gamma and sigma are static hyperparameters (sigma fixes the blur kernel size,
    which is structural in kornia.filters.GaussianBlur2d).
    """
    gamma = float(gamma)
    sigma = int(sigma)
    N, C, H, W = reals.shape
    NC = N * C

    TB = _choose_tile_batch(NC, W)          # images packed side-by-side along lanes
    G = NC // TB                            # grid steps
    TBW = TB * W
    Hp = -(-H // 8) * 8                     # pad H to a multiple of 8 for (8,128) tiling

    # Lane-dense layout: (G*Hp, TB*W); each grid step sees one (Hp, TB*W) slab of TB images.
    def to_slab(x):
        x = x.astype(jnp.float32).reshape(G, TB, H, W)
        if Hp != H:
            x = jnp.pad(x, ((0, 0), (0, 0), (0, Hp - H), (0, 0)))
        return x.transpose(0, 2, 1, 3).reshape(G * Hp, TBW)

    reals_s = to_slab(reals)
    fakes_s = to_slab(fakes)

    DH, DWT, AH, AWT = _gmse_constants(H, Hp, W, TB, sigma)

    slab = pl.BlockSpec((Hp, TBW), lambda i: (i, 0))
    const = lambda n: pl.BlockSpec((n, n), lambda i: (0, 0))

    # Explicit VMEM budget (v7x has 64 MiB total): 2 slab inputs x 2 pipeline buffers,
    # constants (double-buffered by default), plus intermediates.
    slab_bytes = Hp * TBW * 4
    const_bytes = 2 * Hp * Hp * 2 + 2 * TBW * TBW * 2
    footprint = 2 * 2 * slab_bytes + 2 * const_bytes + 10 * slab_bytes
    vmem_limit = int(min(max(2 * footprint, 32 << 20), 64 << 20))

    partials = pl.pallas_call(
        _make_gmse_kernel(gamma, H, Hp),
        out_shape=jax.ShapeDtypeStruct((G, 4), jnp.float32),
        grid=(G,),
        in_specs=[slab, slab, const(Hp), const(TBW), const(Hp), const(TBW)],
        out_specs=pl.BlockSpec((1, 4), lambda i: (i, 0), memory_space=pltpu.SMEM),
        compiler_params=pltpu.CompilerParams(
            dimension_semantics=("parallel",),
            vmem_limit_bytes=vmem_limit,
        ),
    )(reals_s, fakes_s, DH, DWT, AH, AWT)

    mn = jnp.min(partials[:, 0])
    mx = jnp.max(partials[:, 1])
    s1 = jnp.sum(partials[:, 2])
    s2 = jnp.sum(partials[:, 3])

    # mean(weight * d^2) where weight = 0.8*(offset - mn)/(mx - mn + eps) + 0.2:
    #   = (0.8 * (S1 - mn*S2) / (mx - mn + eps) + 0.2 * S2) / (NC*H*W)
    total = jnp.float32(NC * H * W)
    loss = (jnp.float32(0.8) * (s1 - mn * s2) / (mx - mn + jnp.float32(1e-8))
            + jnp.float32(0.2) * s2) / total
    return loss


# --------------------------- pure-JAX reference (for checking) ---------------------------

def gmse_reference(fakes, reals, gamma, sigma):
    reals = reals.astype(jnp.float32)
    fakes = fakes.astype(jnp.float32)
    xd = jnp.diff(reals, axis=2, append=reals[:, :, -1:, :])
    yd = jnp.diff(reals, axis=3, append=reals[:, :, :, -1:])
    disp = jnp.sqrt(xd ** 2 + yd ** 2)
    k1d = jnp.asarray(gaussian_kernel_1d(sigma))
    r = (k1d.shape[0] - 1) // 2
    H, W = reals.shape[2], reals.shape[3]
    p = jnp.pad(disp, ((0, 0), (0, 0), (r, r), (0, 0)), mode="reflect")
    bh = sum(k1d[t] * p[:, :, t:t + H, :] for t in range(2 * r + 1))
    p2 = jnp.pad(bh, ((0, 0), (0, 0), (0, 0), (r, r)), mode="reflect")
    blur = sum(k1d[t] * p2[:, :, :, t:t + W] for t in range(2 * r + 1))
    offset = blur ** jnp.float32(gamma)
    mn, mx = offset.min(), offset.max()
    norm = (offset - mn) / (mx - mn + 1e-8)
    weight = norm * 0.8 + 0.2
    return jnp.mean(weight * (reals - fakes) ** 2)


if __name__ == "__main__":
    key = jax.random.PRNGKey(0)
    kf, kr = jax.random.split(key)
    N, C, H, W = 2, 4, 16, 16
    fakes = jax.random.normal(kf, (N, C, H, W), dtype=jnp.float32)
    reals = jax.random.normal(kr, (N, C, H, W), dtype=jnp.float32)
    gamma = 1.5
    sigma = 1   # static: blur kernel size = 6 * sigma + 1 = 7

    loss = jax.block_until_ready(gmse_loss(fakes, reals, gamma, sigma))
    ref = jax.block_until_ready(gmse_reference(fakes, reals, gamma, sigma))

    rel_err = abs(float(loss) - float(ref)) / max(1e-12, abs(float(ref)))
    assert rel_err < 2e-2, (float(loss), float(ref), rel_err)
    print("KERNEL_OK")
</pallas_src>

<mosaic_0001>
module attributes {stable_mosaic.version = 11 : i64} {
  func.func @kernel(%arg0: i32, %arg1: memref<16x128xf32, #tpu.memory_space<vmem>>, %arg2: memref<16x128xf32, #tpu.memory_space<vmem>>, %arg3: memref<16x16xbf16, #tpu.memory_space<vmem>>, %arg4: memref<128x128xbf16, #tpu.memory_space<vmem>>, %arg5: memref<16x16xbf16, #tpu.memory_space<vmem>>, %arg6: memref<128x128xbf16, #tpu.memory_space<vmem>>, %arg7: memref<1x4xf32, #tpu.memory_space<smem>>) attributes {dimension_semantics = [#tpu.dimension_semantics<parallel>], iteration_bounds = array<i64: 1>, scalar_prefetch = 0 : i64, scratch_operands = 0 : i64, tpu.core_type = #tpu.core_type<tc>, window_params = [{transform_indices = @transform_0, window_bounds = array<i64: 16, 128>}, {transform_indices = @transform_1, window_bounds = array<i64: 16, 128>}, {pipeline_mode = #tpu.pipeline_mode<synchronous>, transform_indices = @transform_2, window_bounds = array<i64: 16, 16>}, {pipeline_mode = #tpu.pipeline_mode<synchronous>, transform_indices = @transform_3, window_bounds = array<i64: 128, 128>}, {pipeline_mode = #tpu.pipeline_mode<synchronous>, transform_indices = @transform_4, window_bounds = array<i64: 16, 16>}, {pipeline_mode = #tpu.pipeline_mode<synchronous>, transform_indices = @transform_5, window_bounds = array<i64: 128, 128>}, {transform_indices = @transform_6, window_bounds = array<i64: 1, 4>}]} {
    %c0 = arith.constant 0 : index
    %c0_0 = arith.constant 0 : index
    %0 = vector.load %arg1[%c0, %c0_0] : memref<16x128xf32, #tpu.memory_space<vmem>>, vector<16x128xf32>
    %c0_1 = arith.constant 0 : index
    %c0_2 = arith.constant 0 : index
    %1 = vector.load %arg2[%c0_1, %c0_2] : memref<16x128xf32, #tpu.memory_space<vmem>>, vector<16x128xf32>
    %2 = arith.truncf %0 : vector<16x128xf32> to vector<16x128xbf16>
    %c0_3 = arith.constant 0 : index
    %c0_4 = arith.constant 0 : index
    %3 = vector.load %arg3[%c0_3, %c0_4] : memref<16x16xbf16, #tpu.memory_space<vmem>>, vector<16x16xbf16>
    %cst = arith.constant dense<0.000000e+00> : vector<16x128xf32>
    %4 = tpu.matmul %3, %2, %cst {dimension_numbers = #tpu.dot_dimension_numbers<[1], [0], [0], [1], [0, 0, 1, 1], [], []>} : vector<16x16xbf16>, vector<16x128xbf16>, vector<16x128xf32> -> vector<16x128xf32>
    %c0_5 = arith.constant 0 : index
    %c0_6 = arith.constant 0 : index
    %5 = vector.load %arg4[%c0_5, %c0_6] : memref<128x128xbf16, #tpu.memory_space<vmem>>, vector<128x128xbf16>
    %cst_7 = arith.constant dense<0.000000e+00> : vector<16x128xf32>
    %6 = tpu.matmul %2, %5, %cst_7 {dimension_numbers = #tpu.dot_dimension_numbers<[1], [0], [0], [1], [0, 0, 1, 1], [], []>} : vector<16x128xbf16>, vector<128x128xbf16>, vector<16x128xf32> -> vector<16x128xf32>
    %7 = arith.mulf %4, %4 : vector<16x128xf32>
    %8 = arith.mulf %6, %6 : vector<16x128xf32>
    %9 = arith.addf %7, %8 : vector<16x128xf32>
    %10 = math.sqrt %9 : vector<16x128xf32>
    %c0_8 = arith.constant 0 : index
    %c0_9 = arith.constant 0 : index
    %11 = vector.load %arg5[%c0_8, %c0_9] : memref<16x16xbf16, #tpu.memory_space<vmem>>, vector<16x16xbf16>
    %12 = arith.truncf %10 : vector<16x128xf32> to vector<16x128xbf16>
    %cst_10 = arith.constant dense<0.000000e+00> : vector<16x128xf32>
    %13 = tpu.matmul %11, %12, %cst_10 {dimension_numbers = #tpu.dot_dimension_numbers<[1], [0], [0], [1], [0, 0, 1, 1], [], []>} : vector<16x16xbf16>, vector<16x128xbf16>, vector<16x128xf32> -> vector<16x128xf32>
    %14 = arith.truncf %13 : vector<16x128xf32> to vector<16x128xbf16>
    %c0_11 = arith.constant 0 : index
    %c0_12 = arith.constant 0 : index
    %15 = vector.load %arg6[%c0_11, %c0_12] : memref<128x128xbf16, #tpu.memory_space<vmem>>, vector<128x128xbf16>
    %cst_13 = arith.constant dense<0.000000e+00> : vector<16x128xf32>
    %16 = tpu.matmul %14, %15, %cst_13 {dimension_numbers = #tpu.dot_dimension_numbers<[1], [0], [0], [1], [0, 0, 1, 1], [], []>} : vector<16x128xbf16>, vector<128x128xbf16>, vector<16x128xf32> -> vector<16x128xf32>
    %cst_14 = arith.constant 1.000000e-30 : f32
    %17 = vector.broadcast %cst_14 : f32 to vector<16x128xf32>
    %18 = arith.maximumf %16, %17 : vector<16x128xf32>
    %19 = math.log %18 : vector<16x128xf32>
    %cst_15 = arith.constant 1.500000e+00 : f32
    %20 = vector.broadcast %cst_15 : f32 to vector<16x128xf32>
    %21 = arith.mulf %20, %19 : vector<16x128xf32>
    %22 = math.exp %21 : vector<16x128xf32>
    %23 = arith.subf %0, %1 : vector<16x128xf32>
    %24 = arith.mulf %23, %23 : vector<16x128xf32>
    %25 = vector.shape_cast %22 : vector<16x128xf32> to vector<1x16x128xf32>
    %cst_16 = arith.constant dense<0x7F800000> : vector<1xf32>
    %26 = vector.multi_reduction <minimumf>, %25, %cst_16 [1, 2] : vector<1x16x128xf32> to vector<1xf32>
    %27 = vector.shape_cast %26 : vector<1xf32> to vector<1x1x1xf32>
    %28 = vector.extract %27[0, 0, 0] : f32 from vector<1x1x1xf32>
    %29 = vector.shape_cast %22 : vector<16x128xf32> to vector<1x16x128xf32>
    %cst_17 = arith.constant dense<0xFF800000> : vector<1xf32>
    %30 = vector.multi_reduction <maximumf>, %29, %cst_17 [1, 2] : vector<1x16x128xf32> to vector<1xf32>
    %31 = vector.shape_cast %30 : vector<1xf32> to vector<1x1x1xf32>
    %32 = vector.extract %31[0, 0, 0] : f32 from vector<1x1x1xf32>
    %c0_18 = arith.constant 0 : index
    %c0_19 = arith.constant 0 : index
    %33 = memref.load %arg7[%c0_18, %c0_19] : memref<1x4xf32, #tpu.memory_space<smem>>
    memref.store %28, %arg7[%c0_18, %c0_19] : memref<1x4xf32, #tpu.memory_space<smem>>
    %c0_20 = arith.constant 0 : index
    %c1 = arith.constant 1 : index
    %34 = memref.load %arg7[%c0_20, %c1] : memref<1x4xf32, #tpu.memory_space<smem>>
    memref.store %32, %arg7[%c0_20, %c1] : memref<1x4xf32, #tpu.memory_space<smem>>
    %35 = arith.mulf %22, %24 : vector<16x128xf32>
    %36 = vector.shape_cast %35 : vector<16x128xf32> to vector<1x16x128xf32>
    %cst_21 = arith.constant dense<0.000000e+00> : vector<1xf32>
    %37 = vector.multi_reduction <add>, %36, %cst_21 [1, 2] : vector<1x16x128xf32> to vector<1xf32>
    %38 = vector.shape_cast %37 : vector<1xf32> to vector<1x1x1xf32>
    %39 = vector.extract %38[0, 0, 0] : f32 from vector<1x1x1xf32>
    %c0_22 = arith.constant 0 : index
    %c2 = arith.constant 2 : index
    %40 = memref.load %arg7[%c0_22, %c2] : memref<1x4xf32, #tpu.memory_space<smem>>
    memref.store %39, %arg7[%c0_22, %c2] : memref<1x4xf32, #tpu.memory_space<smem>>
    %41 = vector.shape_cast %24 : vector<16x128xf32> to vector<1x16x128xf32>
    %cst_23 = arith.constant dense<0.000000e+00> : vector<1xf32>
    %42 = vector.multi_reduction <add>, %41, %cst_23 [1, 2] : vector<1x16x128xf32> to vector<1xf32>
    %43 = vector.shape_cast %42 : vector<1xf32> to vector<1x1x1xf32>
    %44 = vector.extract %43[0, 0, 0] : f32 from vector<1x1x1xf32>
    %c0_24 = arith.constant 0 : index
    %c3 = arith.constant 3 : index
    %45 = memref.load %arg7[%c0_24, %c3] : memref<1x4xf32, #tpu.memory_space<smem>>
    memref.store %44, %arg7[%c0_24, %c3] : memref<1x4xf32, #tpu.memory_space<smem>>
    return
  }
  func.func @transform_0(%arg0: i32) -> (i32, i32) {
    %c0_i32 = arith.constant 0 : i32
    %c0_i32_0 = arith.constant 0 : i32
    return %arg0, %c0_i32 : i32, i32
  }
  func.func @transform_1(%arg0: i32) -> (i32, i32) {
    %c0_i32 = arith.constant 0 : i32
    %c0_i32_0 = arith.constant 0 : i32
    return %arg0, %c0_i32 : i32, i32
  }
  func.func @transform_2(%arg0: i32) -> (i32, i32) {
    %c0_i32 = arith.constant 0 : i32
    %c0_i32_0 = arith.constant 0 : i32
    %c0_i32_1 = arith.constant 0 : i32
    return %c0_i32, %c0_i32_0 : i32, i32
  }
  func.func @transform_3(%arg0: i32) -> (i32, i32) {
    %c0_i32 = arith.constant 0 : i32
    %c0_i32_0 = arith.constant 0 : i32
    %c0_i32_1 = arith.constant 0 : i32
    return %c0_i32, %c0_i32_0 : i32, i32
  }
  func.func @transform_4(%arg0: i32) -> (i32, i32) {
    %c0_i32 = arith.constant 0 : i32
    %c0_i32_0 = arith.constant 0 : i32
    %c0_i32_1 = arith.constant 0 : i32
    return %c0_i32, %c0_i32_0 : i32, i32
  }
  func.func @transform_5(%arg0: i32) -> (i32, i32) {
    %c0_i32 = arith.constant 0 : i32
    %c0_i32_0 = arith.constant 0 : i32
    %c0_i32_1 = arith.constant 0 : i32
    return %c0_i32, %c0_i32_0 : i32, i32
  }
  func.func @transform_6(%arg0: i32) -> (i32, i32) {
    %c0_i32 = arith.constant 0 : i32
    %c0_i32_0 = arith.constant 0 : i32
    return %arg0, %c0_i32 : i32, i32
  }
}

</mosaic_0001>

<bundles_post_ra>
// kernel: gmse_loss.1
= control target key start
LH: loop header
LB: loop body
LE: loop exit
PB: predicated region body
PF: predicated region fallthrough
CT: control target
= control target key end

     0   :  { %v595_v2 = vmov 0.0   ;;  %vm596_vm0 = vmmov 0   ;;  %vm37_vm1 = vcmask 130048   ;;  %s738_s0 = inlined_call_operand.vmem [shape: f32[16,128], index: 0, kind: input, shape index: {}]   ;;  %s739_s1 = inlined_call_operand.vmem [shape: f32[16,128], index: 1, kind: input, shape index: {}]   ;;  %s740_s2 = inlined_call_operand.vmem [shape: bf16[16,16], index: 2, kind: input, shape index: {}]   ;;  %s741_s3 = inlined_call_operand.vmem [shape: bf16[128,128], index: 3, kind: input, shape index: {}]   ;;  %s742_s4 = inlined_call_operand.vmem [shape: bf16[16,16], index: 4, kind: input, shape index: {}]   ;;  %s743_s5 = inlined_call_operand.vmem [shape: bf16[128,128], index: 5, kind: input, shape index: {}]   ;;  %s744_s6 = inlined_call_operand.vmem [shape: f32[1,4], index: 6, kind: output, shape index: {}]  }
   0x1   :  { %v636_v0 = vld [vmem:[%s738_s0] sm:$0xff]  ;;  %v641_v1 = vld [vmem:[%s738_s0 + $0x8] sm:$0xff]  ;;  %488 = vmatprep.subr.bf16.mxu1 %v595_v2  ;;  %490 = vmatprep.mubr.msk.bf16.mxu1 %vm596_vm0, %v595_v2  ;;  %v554_v7 = vld [vmem:[%s741_s3 + $0x10] sm:$0xff]  }
   0x2   :  { %v29_v3 = vpack.c.bf16 %v641_v1, %v636_v0  ;;  %v551_v4 = vld [vmem:[%s740_s2] sm:$0xff]   ;;  %514 = vmatprep.subr.bf16.mxu0 %v595_v2  ;;  %516 = vmatprep.mubr.msk.bf16.mxu0 %vm596_vm0, %v595_v2  ;;  %v553_v6 = vld [vmem:[%s741_s3 + $0x8] sm:$0xff]   ;;  %v555_v8 = vld [vmem:[%s741_s3 + $0x18] sm:$0xff]  }
   0x3   :  { %v552_v5 = vld [vmem:[%s741_s3] sm:$0xff]  }
   0x4   :  { %489 = vmatpush3.bf16.msra.mxu1 %v29_v3 }
   0x5   :  { %494 = vmatprep.subr.bf16.mxu1 %v595_v2 }
   0x7   :  { %491 = vmatmul.mubr.msk.bf16.vlgmr.msra.gmra.mrb[0].mxu1 %vm37_vm1, %v551_v4 }
   0x8   :  { %495 = vmatpush3.bf16.msra.mxu1 %v552_v5  ;;  %510 = vmatprep.mubr.msk.bf16.mxu1 %vm596_vm0, %v595_v2 }
   0x9   :  { %496 = vmatprep.subr.bf16.mxu1 %v595_v2 }
   0xc   :  { %497 = vmatpush3.bf16.msra.mxu1 %v553_v6 }
   0xd   :  { %498 = vmatprep.subr.bf16.mxu1 %v595_v2 }
  0x10   :  { %499 = vmatpush3.bf16.msra.mxu1 %v554_v7 }
  0x11   :  { %500 = vmatprep.subr.bf16.mxu1 %v595_v2 }
  0x12   :  { %11 = vsyncpa [#allocation3], 0  ;;  %v556_v9 = vld [vmem:[%s741_s3 + $0x20] sm:$0xff]   ;;  %v557_v10 = vld [vmem:[%s741_s3 + $0x28] sm:$0xff]   ;;  %s437_s12 = sshll.u32 %s744_s6, 4  ;;  %s438_s12 = int_to_ptr.vmem [resolvable:$true] %s437_s12 }
  0x13   :  { %v558_v11 = vld [vmem:[%s741_s3 + $0x30] sm:$0xff]   ;;  %v559_v12 = vld [vmem:[%s741_s3 + $0x38] sm:$0xff]   ;;  %v560_v38 = vld [vmem:[%s742_s4] sm:$0xff]   ;;  %s581_s16 = scalar_lea.vmem %s438_s12, 16  ;;  %p586_p1 = scmp.lt.s32.totalorder %s438_s12, %s438_s12 }
  0x14   :  { %501 = vmatpush3.bf16.msra.mxu1 %v555_v8  ;;  %v561_v39 = vld [vmem:[%s743_s5] sm:$0xff]   ;;  %v562_v40 = vld [vmem:[%s743_s5 + $0x8] sm:$0xff]   ;;  %v563_v41 = vld [vmem:[%s743_s5 + $0x10] sm:$0xff]   ;;  %p582_p0 = scmp.ne.s32.totalorder %s438_s12, %s581_s16  ;;  %p587_p2 = scmp.lt.s32.totalorder %s581_s16, %s581_s16 }
  0x15   :  { %502 = vmatprep.subr.bf16.mxu1 %v595_v2  ;;  %v564_v42 = vld [vmem:[%s743_s5 + $0x18] sm:$0xff]   ;;  %v565_v43 = vld [vmem:[%s743_s5 + $0x20] sm:$0xff]   ;;  %v566_v44 = vld [vmem:[%s743_s5 + $0x28] sm:$0xff]  }
  0x16   :  { %v567_v45 = vld [vmem:[%s743_s5 + $0x30] sm:$0xff]   ;;  %v568_v46 = vld [vmem:[%s743_s5 + $0x38] sm:$0xff]   ;;  %v27_v52 = vld [vmem:[%s739_s1] sm:$0xff]  ;;  %p588_p3 = por %p587_p2, %p586_p1 }
  0x17   :  { %v28_v53 = vld [vmem:[%s739_s1 + $0x8] sm:$0xff]  ;;  %v377_v54 = vsub.f32 %v636_v0, %v27_v52 }
  0x18   :  { %503 = vmatpush3.bf16.msra.mxu1 %v556_v9  ;;  %v378_v55 = vsub.f32 %v641_v1, %v28_v53  ;;  %p589_p4 = pnand %p588_p3, %p582_p0 }
  0x19   :  { %504 = vmatprep.subr.bf16.mxu1 %v595_v2  ;;  %v379_v56 = vmul.f32 %v377_v54, %v377_v54 }
  0x1a   :  { %v380_v57 = vmul.f32 %v378_v55, %v378_v55 }
  0x1c   :  { %505 = vmatpush3.bf16.msra.mxu1 %v557_v10  ;;  %v419_v58 = vadd.f32 %v380_v57, %v379_v56 }
  0x1d   :  { %506 = vmatprep.subr.bf16.mxu1 %v595_v2 }
  0x20   :  { %507 = vmatpush3.bf16.msra.mxu1 %v558_v11 }
  0x21   :  { %508 = vmatprep.subr.bf16.mxu1 %v595_v2 }
  0x24   :  { %509 = vmatpush3.bf16.msra.mxu1 %v559_v12 }
  0x27   :  { %511 = vmatmul.mubr.bf16.vlgmr.msra.gmra.mrb[4].mxu1 %v29_v3 }
  0xda   :  { %v75_v13 = vpop.f32.mrb[0].mxu1 }
  0xdb   :  { %v492_v14 = vpop.f32.mrb[1].mxu1  ;;  %v187_v18 = vmul.f32 %v75_v13, %v75_v13 }
  0xdc   :  { %v78_v15 = vpop.f32.mrb[2].mxu1 }
  0xdd   :  { %v493_v16 = vpop.f32.mrb[3].mxu1  ;;  %v188_v22 = vmul.f32 %v78_v15, %v78_v15 }
  0xfa   :  { %v180_v17 = vpop.f32.mrb[4].mxu1 }
  0xfb   :  { %v189_v19 = vmul.f32 %v180_v17, %v180_v17  ;;  %v512_v20 = vpop.f32.mrb[5].mxu1 }
  0xfc   :  { %v183_v21 = vpop.f32.mrb[6].mxu1 }
  0xfd   :  { %v191_v23 = vadd.f32 %v189_v19, %v187_v18  ;;  %v190_v24 = vmul.f32 %v183_v21, %v183_v21  ;;  %v513_v25 = vpop.f32.mrb[7].mxu1 }
  0xff   :  { %v192_v26 = vadd.f32 %v190_v24, %v188_v22  ;;  %569 = vrsqrt.f32 %v191_v23  ;;  %vm195_vm2 = vcmp.eq.f32.partialorder %v191_v23, inf  ;;  %v198_v32 = vand.u32 2147483648, %v191_v23 }
 0x100   :  { %vm197_vm4 = vcmp.eq.f32.partialorder %v191_v23, 0.0 }
 0x101   :  { %571 = vrsqrt.f32 %v192_v26  ;;  %vm202_vm3 = vcmp.eq.f32.partialorder %v192_v26, inf  ;;  %v205_v33 = vand.u32 2147483648, %v192_v26  ;;  %vm204_vm5 = vcmp.eq.f32.partialorder %v192_v26, 0.0 }
 0x109   :  { %v570_v27 = vpop.eup %569 }
 0x10a   :  { %v194_v28 = vmul.f32 %v570_v27, %v191_v23 }
 0x10b   :  { %v572_v29 = vpop.eup %571 }
 0x10c   :  { %v196_v30 = vsel %vm195_vm2, %v191_v23, %v194_v28  ;;  %v201_v31 = vmul.f32 %v572_v29, %v192_v26 }
 0x10d   :  { %v199_v35 = vsel %vm197_vm4, %v198_v32, %v196_v30 }
 0x10e   :  { %v203_v34 = vsel %vm202_vm3, %v192_v26, %v201_v31 }
 0x10f   :  { %v206_v36 = vsel %vm204_vm5, %v205_v33, %v203_v34 }
 0x110   :  { %v209_v37 = vpack.c.bf16 %v206_v36, %v199_v35 }
 0x112   :  { %515 = vmatpush3.bf16.msra.mxu0 %v209_v37 }
 0x113   :  { %520 = vmatprep.subr.bf16.mxu0 %v595_v2 }
 0x115   :  { %517 = vmatmul.mubr.msk.bf16.vlgmr.msra.gmra.mrb[0].mxu0 %vm37_vm1, %v560_v38 }
 0x116   :  { %521 = vmatpush3.bf16.msra.mxu0 %v561_v39  ;;  %536 = vmatprep.mubr.msk.bf16.mxu0 %vm596_vm0, %v595_v2 }
 0x117   :  { %522 = vmatprep.subr.bf16.mxu0 %v595_v2 }
 0x11a   :  { %523 = vmatpush3.bf16.msra.mxu0 %v562_v40 }
 0x11b   :  { %524 = vmatprep.subr.bf16.mxu0 %v595_v2 }
 0x11e   :  { %525 = vmatpush3.bf16.msra.mxu0 %v563_v41 }
 0x11f   :  { %526 = vmatprep.subr.bf16.mxu0 %v595_v2 }
 0x122   :  { %527 = vmatpush3.bf16.msra.mxu0 %v564_v42 }
 0x123   :  { %528 = vmatprep.subr.bf16.mxu0 %v595_v2 }
 0x126   :  { %529 = vmatpush3.bf16.msra.mxu0 %v565_v43 }
 0x127   :  { %530 = vmatprep.subr.bf16.mxu0 %v595_v2 }
 0x12a   :  { %531 = vmatpush3.bf16.msra.mxu0 %v566_v44 }
 0x12b   :  { %532 = vmatprep.subr.bf16.mxu0 %v595_v2 }
 0x12e   :  { %533 = vmatpush3.bf16.msra.mxu0 %v567_v45 }
 0x12f   :  { %534 = vmatprep.subr.bf16.mxu0 %v595_v2 }
 0x132   :  { %535 = vmatpush3.bf16.msra.mxu0 %v568_v46 }
 0x1e8   :  { %v252_v47 = vpop.f32.mrb[0].mxu0 }
 0x1e9   :  { %v518_v48 = vpop.f32.mrb[1].mxu0 }
 0x1ea   :  { %v255_v49 = vpop.f32.mrb[2].mxu0 }
 0x1eb   :  { %v259_v50 = vpack.c.bf16 %v255_v49, %v252_v47  ;;  %v519_v51 = vpop.f32.mrb[3].mxu0 }
 0x1ed   :  { %537 = vmatmul.mubr.bf16.vlgmr.msra.gmra.mrb[4].mxu0 %v259_v50 }
 0x2c0   :  { %v358_v59 = vpop.f32.mrb[4].mxu0 }
 0x2c1   :  { %v365_v60 = vmax.f32 %v358_v59, 1e-30  ;;  %v538_v61 = vpop.f32.mrb[5].mxu0 }
 0x2c2   :  { %v361_v62 = vpop.f32.mrb[6].mxu0 }
 0x2c3   :  { %573 = vlog2.f32 %v365_v60  ;;  %v366_v63 = vmax.f32 %v361_v62, 1e-30  ;;  %v539_v2 = vpop.f32.mrb[7].mxu0 }
 0x2c5   :  { %575 = vlog2.f32 %v366_v63 }
 0x2cd   :  { %v574_v3 = vpop.eup %573 }
 0x2ce   :  { %v368_v4 = vmul.f32 0.6931472, %v574_v3 }
 0x2cf   :  { %v576_v5 = vpop.eup %575 }
 0x2d0   :  { %v371_v6 = vmul.f32 1.5, %v368_v4  ;;  %v370_v7 = vmul.f32 0.6931472, %v576_v5 }
 0x2d2   :  { %v373_v8 = vmul.f32 1.442695, %v371_v6  ;;  %v372_v0 = vmul.f32 1.5, %v370_v7 }
 0x2d4   :  { %577 = vpow2.f32 %v373_v8  ;;  %v375_v1 = vmul.f32 1.442695, %v372_v0 }
 0x2d6   :  { %579 = vpow2.f32 %v375_v1 }
 0x2de   :  { %v578_v9 = vpop.eup %577 }
 0x2df   :  { %v405_v10 = vmul.f32 %v578_v9, %v379_v56 }
 0x2e0   :  { %v580_v11 = vpop.eup %579 }
 0x2e1   :  { %v381_v12 = vmin.f32 %v578_v9, %v580_v11  ;;  %v406_v13 = vmul.f32 %v580_v11, %v380_v57  ;;  %v391_v14 = vmax.f32 %v578_v9, %v580_v11 }
 0x2e3   :  { %382 = vmin.xlane.f32.xlu0 %v381_v12  ;;  %v407_v15 = vadd.f32 %v406_v13, %v405_v10 }
 0x2e5   :  { %408 = vadd.xlane.f32.xlu1 %v407_v15 }
 0x2e7   :  { %392 = vmax.xlane.f32.xlu0 %v391_v14 }
 0x2e9   :  { %420 = vadd.xlane.f32.xlu1 %v419_v58 }
 0x370   :  { %v383_v16 = vpop.xlane.xlu0 %382 }
 0x371   :  { %v384_v17 = vrot.slane %v383_v16, 4 }
 0x372   :  { %v409_v18 = vpop.xlane.xlu1 %408 }
 0x373   :  { %v385_v19 = vmin.f32 %v383_v16, %v384_v17  ;;  %v410_v20 = vrot.slane %v409_v18, 4 }
 0x374   :  { %v393_v21 = vpop.xlane.xlu0 %392 }
 0x375   :  { %v386_v22 = vrot.slane %v385_v19, 2  ;;  %v411_v23 = vadd.f32 %v410_v20, %v409_v18  ;;  %v394_v24 = vrot.slane %v393_v21, 4 }
 0x376   :  { %v421_v25 = vpop.xlane.xlu1 %420 }
 0x377   :  { %v412_v26 = vrot.slane %v411_v23, 2  ;;  %v395_v27 = vmax.f32 %v393_v21, %v394_v24  ;;  %v422_v28 = vrot.slane %v421_v25, 4  ;;  %v387_v29 = vmin.f32 %v385_v19, %v386_v22 }
 0x379   :  { %v396_v30 = vrot.slane %v395_v27, 2  ;;  %v423_v31 = vadd.f32 %v422_v28, %v421_v25  ;;  %v388_v32 = vrot.slane %v387_v29, 1  ;;  %v413_v33 = vadd.f32 %v412_v26, %v411_v23 }
 0x37b   :  { %v397_v34 = vmax.f32 %v395_v27, %v396_v30  ;;  %v424_v35 = vrot.slane %v423_v31, 2  ;;  %v389_v36 = vmin.f32 %v387_v29, %v388_v32  ;;  %v414_v37 = vrot.slane %v413_v33, 1 }
 0x37d   :  { %v425_v38 = vadd.f32 %v424_v35, %v423_v31  ;;  %540 = vpush %v389_v36  ;;  %v398_v39 = vrot.slane %v397_v34, 1  ;;  %v415_v42 = vadd.f32 %v414_v37, %v413_v33 }
 0x37f   :  { %v399_v40 = vmax.f32 %v397_v34, %v398_v39  ;;  %v426_v41 = vrot.slane %v425_v38, 1 }
 0x381   :  { %542 = vpush %v399_v40  ;;  %v427_v43 = vadd.f32 %v426_v41, %v425_v38 }
 0x382   :  { %544 = vpush %v415_v42 }
 0x383   :  { %546 = vpush %v427_v43 }
 0x3ae   :  { %s541_s1 = spop %540 }
 0x3af   :  { %402 = sst [smem:[#allocation2]] %s541_s1 }
 0x3b2   :  { %s543_s13 = spop %542 }
 0x3b3   :  { %404 = sst [smem:[#allocation2 + $0x1]] %s543_s13  ;;  %s545_s14 = spop %544 }
 0x3b4   :  { %418 = sst [smem:[#allocation2 + $0x2]] %s545_s14  ;;  %s547_s15 = spop %546 }
 0x3b5   :  { %430 = sst [smem:[#allocation2 + $0x3]] %s547_s15 }
 0x3b6   :  { %592 = shalt.err (!%p589_p4)
}
 0x3b7   :  { %s597_s3 = smov [#allocation2]  }
 0x3b8   :  { %440 = dma.smem_to_vmem %s597_s3, 16, %s438_s12, [#allocation3]  }
 0x3b9   :  { %593 = dma.done.wait [#allocation3], 16  }
 0x3ba   :  { %594 = vsyncadd [#allocation3], 4294967280 }
 0x3bb   :  { %444 = sfence }
 0x3bc   :  { %445 = vsyncpa [#allocation3], 1 }

</bundles_post_ra>
